<compile_context>
chip_gen: v7x
topology: tpu7x:2x2x1
jax: 0.10.0
libtpu: 0.0.40
codegen_flags: <defaults>
</compile_context>

<pallas_src>
import functools

import jax
import jax.numpy as jnp
from jax.experimental import pallas as pl
from jax.experimental.pallas import tpu as pltpu


def _round_up(x, m):
    return (x + m - 1) // m * m


def _pad_cols_for_tiling(n_cols, tn_max=512):
    """Output (N) tiling: lane-dense tile (multiple of 128) and padded width."""
    tn = min(tn_max, _round_up(n_cols, 128))
    return _round_up(n_cols, tn), tn


_VMEM_LIMIT = None


def _pick_vmem_limit():
    """Half of physical VMEM, capped at 64 MiB (v7x has only 64 MiB total)."""
    global _VMEM_LIMIT
    if _VMEM_LIMIT is None:
        try:
            cap = int(pltpu.get_tpu_info().vmem_capacity_bytes)
        except Exception:
            cap = 128 * 1024 * 1024
        _VMEM_LIMIT = min(64 * 1024 * 1024, cap // 2)
    return _VMEM_LIMIT


def fused_mlp_kernel(x_ref, w1_ref, b1_ref, w2_ref, b2_ref,
                     out_ref, ids_ref, h_ref, m_ref, a_ref, *, n_valid):
    """One (row tile i, output tile j) step of out = gelu(x@w1 + b1) @ w2 + b2.

    The hidden activation for the row tile is computed once (j == 0), cast to
    bf16 and cached in VMEM scratch for the remaining output tiles.  A running
    fp32 (max, argmax) over the output axis is carried in scratch; the argmax
    ("sampled id") is emitted on the last output tile.  Output columns
    >= n_valid (lane padding) are excluded from the argmax.  MXU operands are
    bf16; bias / GELU / accumulation / argmax are fp32.
    """
    j = pl.program_id(1)

    @pl.when(j == 0)
    def _():
        h = jnp.dot(x_ref[...], w1_ref[...], preferred_element_type=jnp.float32)
        h = jax.nn.gelu(h + b1_ref[...])
        h_ref[...] = h.astype(jnp.bfloat16)                 # one cast per row tile
        m_ref[...] = jnp.full(m_ref.shape, -jnp.inf, jnp.float32)
        a_ref[...] = jnp.zeros(a_ref.shape, jnp.int32)

    y = jnp.dot(h_ref[...], w2_ref[...], preferred_element_type=jnp.float32)
    y = y + b2_ref[...]
    out_ref[...] = y.astype(out_ref.dtype)

    # --- fused running argmax over the output (vocab) axis (fp32) ---
    tn = y.shape[-1]
    col = jax.lax.broadcasted_iota(jnp.int32, y.shape, 1) + j * tn
    y_m = jnp.where(col < n_valid, y, -jnp.inf)
    tile_max = jnp.max(y_m, axis=-1, keepdims=True)
    # first-occurrence argmax inside the tile: min of (float-encoded) column
    # indices where the max is attained (f32 min-reduce, XLU friendly).
    idx_f = jnp.where(y_m == tile_max, col.astype(jnp.float32), jnp.float32(1e30))
    tile_arg = jnp.min(idx_f, axis=-1, keepdims=True).astype(jnp.int32)
    better = tile_max > m_ref[...]          # strict: earlier tile wins ties
    a_ref[...] = jnp.where(better, tile_arg, a_ref[...])
    m_ref[...] = jnp.maximum(tile_max, m_ref[...])

    @pl.when(j == pl.num_programs(1) - 1)
    def _():
        ids_ref[...] = a_ref[...]


def fused_mlp(x, w1, b1, w2, b2, *, n_valid_out=None, tm=1024, tn=512,
              out_dtype=jnp.float32):
    """Tiled over rows (tm) and output columns (tn).

    x:  [M, D]  bf16 activations
    w1: [D, H]  bf16, b1: [1, H] fp32     (grid-invariant, single-buffered)
    w2: [H, O]  bf16, b2: [1, O] fp32     (streamed per output tile)
    Returns (out[:M, :n_valid_out], argmax over the first n_valid_out cols).
    Rows are padded to the row tile; output columns are expected to be padded
    to the lane tile at init time (a fallback pad is applied if not).
    """
    M, D = x.shape
    H = w1.shape[1]
    O = w2.shape[1]
    if n_valid_out is None:
        n_valid_out = O

    x = x.astype(jnp.bfloat16)
    w1 = w1.astype(jnp.bfloat16)
    w2 = w2.astype(jnp.bfloat16)
    b1 = b1.reshape(1, H).astype(jnp.float32)
    b2 = b2.reshape(1, O).astype(jnp.float32)

    # --- row tiling: big tiles amortize the streamed w2 weight; keep >= 2
    #     row tiles when possible so v7x's two TensorCores both get work.
    M16 = _round_up(M, 16)                        # bf16 sublane packing
    tm_eff = min(tm, M16)
    if M16 > 16 and (M16 + tm_eff - 1) // tm_eff < 2:
        tm_eff = _round_up(M16 // 2, 16)
    M_pad = _round_up(M, tm_eff)

    # --- output tiling: lane-dense multiple of 128 (padded at init time).
    O_pad, tn_eff = _pad_cols_for_tiling(O, tn)

    xp = x if M_pad == M else jnp.pad(x, ((0, M_pad - M), (0, 0)))
    if O_pad != O:   # fallback only; init_params already pads to the tile
        w2 = jnp.pad(w2, ((0, 0), (0, O_pad - O)))
        b2 = jnp.pad(b2, ((0, 0), (0, O_pad - O)))

    grid = (M_pad // tm_eff, O_pad // tn_eff)
    kernel = functools.partial(fused_mlp_kernel, n_valid=n_valid_out)

    def run(resident_kwargs):
        return pl.pallas_call(
            kernel,
            out_shape=(jax.ShapeDtypeStruct((M_pad, O_pad), out_dtype),
                       jax.ShapeDtypeStruct((M_pad, 1), jnp.int32)),
            grid_spec=pltpu.PrefetchScalarGridSpec(
                num_scalar_prefetch=0,
                grid=grid,
                in_specs=[
                    pl.BlockSpec((tm_eff, D), lambda i, j: (i, 0)),    # x rows
                    pl.BlockSpec((D, H), lambda i, j: (0, 0),
                                 **resident_kwargs),                   # w1
                    pl.BlockSpec((1, H), lambda i, j: (0, 0),
                                 **resident_kwargs),                   # b1
                    pl.BlockSpec((H, tn_eff), lambda i, j: (0, j)),    # w2 tile
                    pl.BlockSpec((1, tn_eff), lambda i, j: (0, j)),    # b2 tile
                ],
                out_specs=(
                    pl.BlockSpec((tm_eff, tn_eff), lambda i, j: (i, j)),  # logits
                    pl.BlockSpec((tm_eff, 1), lambda i, j: (i, 0)),       # argmax
                ),
                scratch_shapes=[
                    pltpu.VMEM((tm_eff, H), jnp.bfloat16),   # cached GELU act
                    pltpu.VMEM((tm_eff, 1), jnp.float32),    # running max
                    pltpu.VMEM((tm_eff, 1), jnp.int32),      # running argmax
                ],
            ),
            compiler_params=pltpu.CompilerParams(
                dimension_semantics=("parallel", "arbitrary"),
                vmem_limit_bytes=_pick_vmem_limit(),
            ),
        )(xp, w1, b1, w2, b2)

    try:
        # w1/b1 never change across the grid -> single-buffer them (VMEM).
        out, ids = run({"pipeline_mode": pl.Buffered(1)})
    except Exception:
        # Fallback for Pallas versions without single-buffered BlockSpecs.
        out, ids = run({})

    return out[:M, :n_valid_out], ids[:M, 0]


def init_params(key, vocab, hidden_g, hidden_d, *, tn=512):
    """Weights in bf16 (MXU operands), biases fp32.  Lane padding of the
    vocab projection and the discriminator head is done HERE, once, not per
    forward.  Discriminator head is 256 lanes wide (column 0 is the real
    logit) so stores are lane-dense and the 256-wide MXU is fully used."""
    ks = jax.random.split(key, 6)
    s = 0.02
    vocab_pad, _ = _pad_cols_for_tiling(vocab, tn)
    head_pad = 256

    gen_wv = jax.random.normal(ks[2], (hidden_g, vocab), jnp.float32) * s
    gen_wv = jnp.pad(gen_wv, ((0, 0), (0, vocab_pad - vocab)))
    disc_wh = jax.random.normal(ks[5], (hidden_d, 1), jnp.float32) * s
    disc_wh = jnp.pad(disc_wh, ((0, 0), (0, head_pad - 1)))

    return {
        "gen_emb": (jax.random.normal(ks[0], (vocab, hidden_g), jnp.float32) * s
                    ).astype(jnp.bfloat16),
        "gen_w1": (jax.random.normal(ks[1], (hidden_g, hidden_g), jnp.float32) * s
                   ).astype(jnp.bfloat16),
        "gen_b1": jnp.zeros((1, hidden_g), jnp.float32),
        "gen_wv": gen_wv.astype(jnp.bfloat16),
        "gen_bv": jnp.zeros((1, vocab_pad), jnp.float32),
        "disc_emb": (jax.random.normal(ks[3], (vocab, hidden_d), jnp.float32) * s
                     ).astype(jnp.bfloat16),
        "disc_w1": (jax.random.normal(ks[4], (hidden_d, hidden_d), jnp.float32) * s
                    ).astype(jnp.bfloat16),
        "disc_b1": jnp.zeros((1, hidden_d), jnp.float32),
        "disc_wh": disc_wh.astype(jnp.bfloat16),
        "disc_bh": jnp.zeros((1, head_pad), jnp.float32),
    }


def electra_forward(input_ids, params, vocab):
    B, S = input_ids.shape
    flat_ids = input_ids.reshape(-1)

    # ---- generator ----
    # TODO(synk): embedding gather stays in plain JAX; fusing it (scalar
    # prefetch + per-row DMA gather into the kernel's x tile) would remove
    # the [M, H] HBM round trip between the gather and the pallas_call.
    gen_x = jnp.take(params["gen_emb"], flat_ids, axis=0)          # bf16 [B*S, Hg]
    gen_logits, sampled = fused_mlp(
        gen_x, params["gen_w1"], params["gen_b1"],
        params["gen_wv"], params["gen_bv"],
        n_valid_out=vocab,
        out_dtype=jnp.bfloat16,                                    # halve writeback
    )  # [B*S, V] bf16, [B*S] int32 (argmax over fp32 logits, fused in-kernel)

    # deterministic "sampling" of replacement tokens (argmax) and masking
    sampled = sampled.astype(flat_ids.dtype)
    positions = jnp.arange(B * S)
    mlm_mask = (positions % 4) == 0          # mask every 4th position
    corrupted = jnp.where(mlm_mask, sampled, flat_ids)
    is_replaced = (corrupted != flat_ids).astype(jnp.float32)

    # ---- discriminator ----
    disc_x = jnp.take(params["disc_emb"], corrupted, axis=0)       # bf16 [B*S, Hd]
    disc_out, _ = fused_mlp(
        disc_x, params["disc_w1"], params["disc_b1"],
        params["disc_wh"], params["disc_bh"],
        n_valid_out=1,
        out_dtype=jnp.float32,
    )  # [B*S, 1]
    disc_logits = disc_out[:, 0].reshape(B, S)

    return gen_logits.reshape(B, S, -1), disc_logits, is_replaced.reshape(B, S)


if __name__ == "__main__":
    B, S = 2, 8
    VOCAB = 64
    HIDDEN_G = 32
    HIDDEN_D = 32

    key = jax.random.PRNGKey(0)
    k_ids, k_params = jax.random.split(key)
    input_ids = jax.random.randint(k_ids, (B, S), 0, VOCAB, dtype=jnp.int32)
    params = init_params(k_params, VOCAB, HIDDEN_G, HIDDEN_D)

    gen_logits, disc_logits, labels = electra_forward(input_ids, params, VOCAB)
    jax.block_until_ready((gen_logits, disc_logits, labels))

    assert gen_logits.shape == (B, S, VOCAB)
    assert disc_logits.shape == (B, S)
    assert labels.shape == (B, S)
    assert bool(jnp.all(jnp.isfinite(disc_logits)))
    # replacements can only occur at the (deterministically) masked positions
    mask = ((jnp.arange(B * S) % 4) == 0).reshape(B, S)
    assert bool(jnp.all(jnp.where(mask, True, labels == 0.0)))

    print("KERNEL_OK")
</pallas_src>

<mosaic_0001>
module attributes {stable_mosaic.version = 11 : i64} {
  func.func @fused_mlp_kernel(%arg0: i32, %arg1: i32, %arg2: memref<16x32xbf16, #tpu.memory_space<vmem>>, %arg3: memref<32x32xbf16, #tpu.memory_space<vmem>>, %arg4: memref<1x32xf32, #tpu.memory_space<vmem>>, %arg5: memref<32x128xbf16, #tpu.memory_space<vmem>>, %arg6: memref<1x128xf32, #tpu.memory_space<vmem>>, %arg7: memref<16x128xbf16, #tpu.memory_space<vmem>>, %arg8: memref<16x1xi32, #tpu.memory_space<vmem>>, %arg9: memref<16x32xbf16, #tpu.memory_space<vmem>>, %arg10: memref<16x1xf32, #tpu.memory_space<vmem>>, %arg11: memref<16x1xi32, #tpu.memory_space<vmem>>) attributes {dimension_semantics = [#tpu.dimension_semantics<parallel>, #tpu.dimension_semantics<arbitrary>], iteration_bounds = array<i64: 1, 1>, scalar_prefetch = 0 : i64, scratch_operands = 3 : i64, tpu.core_type = #tpu.core_type<tc>, window_params = [{transform_indices = @transform_0, window_bounds = array<i64: 16, 32>}, {pipeline_mode = #tpu.pipeline_mode<synchronous>, transform_indices = @transform_1, window_bounds = array<i64: 32, 32>}, {pipeline_mode = #tpu.pipeline_mode<synchronous>, transform_indices = @transform_2, window_bounds = array<i64: 1, 32>}, {transform_indices = @transform_3, window_bounds = array<i64: 32, 128>}, {transform_indices = @transform_4, window_bounds = array<i64: 1, 128>}, {transform_indices = @transform_5, window_bounds = array<i64: 16, 128>}, {transform_indices = @transform_6, window_bounds = array<i64: 16, 1>}]} {
    %c0_i32 = arith.constant 0 : i32
    %0 = arith.cmpi eq, %arg1, %c0_i32 : i32
    %1 = arith.extui %0 : i1 to i32
    %c0_i32_0 = arith.constant 0 : i32
    %2 = arith.cmpi ne, %1, %c0_i32_0 : i32
    scf.if %2 {
      %c0_24 = arith.constant 0 : index
      %c0_25 = arith.constant 0 : index
      %40 = vector.load %arg2[%c0_24, %c0_25] : memref<16x32xbf16, #tpu.memory_space<vmem>>, vector<16x32xbf16>
      %c0_26 = arith.constant 0 : index
      %c0_27 = arith.constant 0 : index
      %41 = vector.load %arg3[%c0_26, %c0_27] : memref<32x32xbf16, #tpu.memory_space<vmem>>, vector<32x32xbf16>
      %cst_28 = arith.constant dense<0.000000e+00> : vector<16x32xf32>
      %42 = tpu.matmul %40, %41, %cst_28 {dimension_numbers = #tpu.dot_dimension_numbers<[1], [0], [0], [1], [0, 0, 1, 1], [], []>} : vector<16x32xbf16>, vector<32x32xbf16>, vector<16x32xf32> -> vector<16x32xf32>
      %c0_29 = arith.constant 0 : index
      %c0_30 = arith.constant 0 : index
      %43 = vector.load %arg4[%c0_29, %c0_30] : memref<1x32xf32, #tpu.memory_space<vmem>>, vector<1x32xf32>
      %44 = vector.broadcast %43 : vector<1x32xf32> to vector<16x32xf32>
      %45 = arith.addf %42, %44 : vector<16x32xf32>
      %46 = arith.mulf %45, %45 : vector<16x32xf32>
      %47 = arith.mulf %45, %46 : vector<16x32xf32>
      %cst_31 = arith.constant 4.471500e-02 : f32
      %48 = vector.broadcast %cst_31 : f32 to vector<16x32xf32>
      %49 = arith.mulf %48, %47 : vector<16x32xf32>
      %50 = arith.addf %45, %49 : vector<16x32xf32>
      %cst_32 = arith.constant 0.797884583 : f32
      %51 = vector.broadcast %cst_32 : f32 to vector<16x32xf32>
      %52 = arith.mulf %51, %50 : vector<16x32xf32>
      %53 = math.tanh %52 : vector<16x32xf32>
      %cst_33 = arith.constant 1.000000e+00 : f32
      %54 = vector.broadcast %cst_33 : f32 to vector<16x32xf32>
      %55 = arith.addf %54, %53 : vector<16x32xf32>
      %cst_34 = arith.constant 5.000000e-01 : f32
      %56 = vector.broadcast %cst_34 : f32 to vector<16x32xf32>
      %57 = arith.mulf %56, %55 : vector<16x32xf32>
      %58 = arith.mulf %45, %57 : vector<16x32xf32>
      %59 = arith.truncf %58 : vector<16x32xf32> to vector<16x32xbf16>
      %c0_35 = arith.constant 0 : index
      %c0_36 = arith.constant 0 : index
      %60 = vector.load %arg9[%c0_35, %c0_36] : memref<16x32xbf16, #tpu.memory_space<vmem>>, vector<16x32xbf16>
      tpu.vector_store %arg9[%c0_35, %c0_36], %59 {strides = array<i32>} : memref<16x32xbf16, #tpu.memory_space<vmem>>, vector<16x32xbf16>,
      %cst_37 = arith.constant 0xFF800000 : f32
      %61 = vector.broadcast %cst_37 : f32 to vector<16x1xf32>
      %c0_38 = arith.constant 0 : index
      %c0_39 = arith.constant 0 : index
      %62 = vector.load %arg10[%c0_38, %c0_39] : memref<16x1xf32, #tpu.memory_space<vmem>>, vector<16x1xf32>
      tpu.vector_store %arg10[%c0_38, %c0_39], %61 {strides = array<i32>} : memref<16x1xf32, #tpu.memory_space<vmem>>, vector<16x1xf32>,
      %c0_i32_40 = arith.constant 0 : i32
      %63 = vector.broadcast %c0_i32_40 : i32 to vector<16x1xi32>
      %c0_41 = arith.constant 0 : index
      %c0_42 = arith.constant 0 : index
      %64 = vector.load %arg11[%c0_41, %c0_42] : memref<16x1xi32, #tpu.memory_space<vmem>>, vector<16x1xi32>
      tpu.vector_store %arg11[%c0_41, %c0_42], %63 {strides = array<i32>} : memref<16x1xi32, #tpu.memory_space<vmem>>, vector<16x1xi32>,
    } else {
    }
    %c0 = arith.constant 0 : index
    %c0_1 = arith.constant 0 : index
    %3 = vector.load %arg9[%c0, %c0_1] : memref<16x32xbf16, #tpu.memory_space<vmem>>, vector<16x32xbf16>
    %c0_2 = arith.constant 0 : index
    %c0_3 = arith.constant 0 : index
    %4 = vector.load %arg5[%c0_2, %c0_3] : memref<32x128xbf16, #tpu.memory_space<vmem>>, vector<32x128xbf16>
    %cst = arith.constant dense<0.000000e+00> : vector<16x128xf32>
    %5 = tpu.matmul %3, %4, %cst {dimension_numbers = #tpu.dot_dimension_numbers<[1], [0], [0], [1], [0, 0, 1, 1], [], []>} : vector<16x32xbf16>, vector<32x128xbf16>, vector<16x128xf32> -> vector<16x128xf32>
    %c0_4 = arith.constant 0 : index
    %c0_5 = arith.constant 0 : index
    %6 = vector.load %arg6[%c0_4, %c0_5] : memref<1x128xf32, #tpu.memory_space<vmem>>, vector<1x128xf32>
    %7 = vector.broadcast %6 : vector<1x128xf32> to vector<16x128xf32>
    %8 = arith.addf %5, %7 : vector<16x128xf32>
    %9 = arith.truncf %8 : vector<16x128xf32> to vector<16x128xbf16>
    %c0_6 = arith.constant 0 : index
    %c0_7 = arith.constant 0 : index
    %10 = vector.load %arg7[%c0_6, %c0_7] : memref<16x128xbf16, #tpu.memory_space<vmem>>, vector<16x128xbf16>
    tpu.vector_store %arg7[%c0_6, %c0_7], %9 {strides = array<i32>} : memref<16x128xbf16, #tpu.memory_space<vmem>>, vector<16x128xbf16>,
    %11 = tpu.iota {dimensions = array<i32: 1>} : vector<16x128xi32>
    %c128_i32 = arith.constant 128 : i32
    %12 = arith.muli %arg1, %c128_i32 : i32
    %13 = vector.broadcast %12 : i32 to vector<16x128xi32>
    %14 = arith.addi %11, %13 : vector<16x128xi32>
    %c64_i32 = arith.constant 64 : i32
    %15 = vector.broadcast %c64_i32 : i32 to vector<16x128xi32>
    %16 = arith.cmpi slt, %14, %15 : vector<16x128xi32>
    %cst_8 = arith.constant 0xFF800000 : f32
    %17 = vector.broadcast %cst_8 : f32 to vector<16x128xf32>
    %18 = arith.select %16, %8, %17 : vector<16x128xi1>, vector<16x128xf32>
    %cst_9 = arith.constant dense<0xFF800000> : vector<16xf32>
    %19 = vector.multi_reduction <maximumf>, %18, %cst_9 [1] : vector<16x128xf32> to vector<16xf32>
    %20 = vector.shape_cast %19 : vector<16xf32> to vector<16x1xf32>
    %21 = vector.broadcast %20 : vector<16x1xf32> to vector<16x128xf32>
    %22 = arith.cmpf oeq, %18, %21 : vector<16x128xf32>
    %23 = arith.sitofp %14 : vector<16x128xi32> to vector<16x128xf32>
    %cst_10 = arith.constant 1.000000e+30 : f32
    %24 = vector.broadcast %cst_10 : f32 to vector<16x128xf32>
    %25 = arith.select %22, %23, %24 : vector<16x128xi1>, vector<16x128xf32>
    %cst_11 = arith.constant dense<0x7F800000> : vector<16xf32>
    %26 = vector.multi_reduction <minimumf>, %25, %cst_11 [1] : vector<16x128xf32> to vector<16xf32>
    %27 = vector.shape_cast %26 : vector<16xf32> to vector<16x1xf32>
    %28 = arith.fptosi %27 : vector<16x1xf32> to vector<16x1xi32>
    %c0_12 = arith.constant 0 : index
    %c0_13 = arith.constant 0 : index
    %29 = vector.load %arg10[%c0_12, %c0_13] : memref<16x1xf32, #tpu.memory_space<vmem>>, vector<16x1xf32>
    %30 = arith.cmpf ogt, %20, %29 : vector<16x1xf32>
    %c0_14 = arith.constant 0 : index
    %c0_15 = arith.constant 0 : index
    %31 = vector.load %arg11[%c0_14, %c0_15] : memref<16x1xi32, #tpu.memory_space<vmem>>, vector<16x1xi32>
    %32 = arith.select %30, %28, %31 : vector<16x1xi1>, vector<16x1xi32>
    %c0_16 = arith.constant 0 : index
    %c0_17 = arith.constant 0 : index
    %33 = vector.load %arg11[%c0_16, %c0_17] : memref<16x1xi32, #tpu.memory_space<vmem>>, vector<16x1xi32>
    tpu.vector_store %arg11[%c0_16, %c0_17], %32 {strides = array<i32>} : memref<16x1xi32, #tpu.memory_space<vmem>>, vector<16x1xi32>,
    %c0_18 = arith.constant 0 : index
    %c0_19 = arith.constant 0 : index
    %34 = vector.load %arg10[%c0_18, %c0_19] : memref<16x1xf32, #tpu.memory_space<vmem>>, vector<16x1xf32>
    %35 = arith.maximumf %20, %34 : vector<16x1xf32>
    %c0_20 = arith.constant 0 : index
    %c0_21 = arith.constant 0 : index
    %36 = vector.load %arg10[%c0_20, %c0_21] : memref<16x1xf32, #tpu.memory_space<vmem>>, vector<16x1xf32>
    tpu.vector_store %arg10[%c0_20, %c0_21], %35 {strides = array<i32>} : memref<16x1xf32, #tpu.memory_space<vmem>>, vector<16x1xf32>,
    %c0_i32_22 = arith.constant 0 : i32
    %37 = arith.cmpi eq, %arg1, %c0_i32_22 : i32
    %38 = arith.extui %37 : i1 to i32
    %c0_i32_23 = arith.constant 0 : i32
    %39 = arith.cmpi ne, %38, %c0_i32_23 : i32
    scf.if %39 {
      %c0_24 = arith.constant 0 : index
      %c0_25 = arith.constant 0 : index
      %40 = vector.load %arg11[%c0_24, %c0_25] : memref<16x1xi32, #tpu.memory_space<vmem>>, vector<16x1xi32>
      %c0_26 = arith.constant 0 : index
      %c0_27 = arith.constant 0 : index
      %41 = vector.load %arg8[%c0_26, %c0_27] : memref<16x1xi32, #tpu.memory_space<vmem>>, vector<16x1xi32>
      tpu.vector_store %arg8[%c0_26, %c0_27], %40 {strides = array<i32>} : memref<16x1xi32, #tpu.memory_space<vmem>>, vector<16x1xi32>,
    } else {
    }
    return
  }
  func.func @transform_0(%arg0: i32, %arg1: i32) -> (i32, i32) {
    %c0_i32 = arith.constant 0 : i32
    %c0_i32_0 = arith.constant 0 : i32
    return %arg0, %c0_i32 : i32, i32
  }
  func.func @transform_1(%arg0: i32, %arg1: i32) -> (i32, i32) {
    %c0_i32 = arith.constant 0 : i32
    %c0_i32_0 = arith.constant 0 : i32
    %c0_i32_1 = arith.constant 0 : i32
    return %c0_i32, %c0_i32_0 : i32, i32
  }
  func.func @transform_2(%arg0: i32, %arg1: i32) -> (i32, i32) {
    %c0_i32 = arith.constant 0 : i32
    %c0_i32_0 = arith.constant 0 : i32
    %c0_i32_1 = arith.constant 0 : i32
    return %c0_i32, %c0_i32_0 : i32, i32
  }
  func.func @transform_3(%arg0: i32, %arg1: i32) -> (i32, i32) {
    %c0_i32 = arith.constant 0 : i32
    %c0_i32_0 = arith.constant 0 : i32
    return %c0_i32, %arg1 : i32, i32
  }
  func.func @transform_4(%arg0: i32, %arg1: i32) -> (i32, i32) {
    %c0_i32 = arith.constant 0 : i32
    %c0_i32_0 = arith.constant 0 : i32
    return %c0_i32, %arg1 : i32, i32
  }
  func.func @transform_5(%arg0: i32, %arg1: i32) -> (i32, i32) {
    %c0_i32 = arith.constant 0 : i32
    return %arg0, %arg1 : i32, i32
  }
  func.func @transform_6(%arg0: i32, %arg1: i32) -> (i32, i32) {
    %c0_i32 = arith.constant 0 : i32
    %c0_i32_0 = arith.constant 0 : i32
    return %arg0, %c0_i32 : i32, i32
  }
}

module attributes {stable_mosaic.version = 11 : i64} {
  func.func @fused_mlp_kernel(%arg0: i32, %arg1: i32, %arg2: memref<16x32xbf16, #tpu.memory_space<vmem>>, %arg3: memref<32x32xbf16, #tpu.memory_space<vmem>>, %arg4: memref<1x32xf32, #tpu.memory_space<vmem>>, %arg5: memref<32x128xbf16, #tpu.memory_space<vmem>>, %arg6: memref<1x128xf32, #tpu.memory_space<vmem>>, %arg7: memref<16x128xbf16, #tpu.memory_space<vmem>>, %arg8: memref<16x1xi32, #tpu.memory_space<vmem>>, %arg9: memref<16x32xbf16, #tpu.memory_space<vmem>>, %arg10: memref<16x1xf32, #tpu.memory_space<vmem>>, %arg11: memref<16x1xi32, #tpu.memory_space<vmem>>) attributes {dimension_semantics = [#tpu.dimension_semantics<parallel>, #tpu.dimension_semantics<arbitrary>], iteration_bounds = array<i64: 1, 1>, scalar_prefetch = 0 : i64, scratch_operands = 3 : i64, tpu.core_type = #tpu.core_type<tc>, window_params = [{transform_indices = @transform_0, window_bounds = array<i64: 16, 32>}, {pipeline_mode = #tpu.pipeline_mode<synchronous>, transform_indices = @transform_1, window_bounds = array<i64: 32, 32>}, {pipeline_mode = #tpu.pipeline_mode<synchronous>, transform_indices = @transform_2, window_bounds = array<i64: 1, 32>}, {transform_indices = @transform_3, window_bounds = array<i64: 32, 128>}, {transform_indices = @transform_4, window_bounds = array<i64: 1, 128>}, {transform_indices = @transform_5, window_bounds = array<i64: 16, 128>}, {transform_indices = @transform_6, window_bounds = array<i64: 16, 1>}]} {
    %c0_i32 = arith.constant 0 : i32
    %0 = arith.cmpi eq, %arg1, %c0_i32 : i32
    %1 = arith.extui %0 : i1 to i32
    %c0_i32_0 = arith.constant 0 : i32
    %2 = arith.cmpi ne, %1, %c0_i32_0 : i32
    scf.if %2 {
      %c0_24 = arith.constant 0 : index
      %c0_25 = arith.constant 0 : index
      %40 = vector.load %arg2[%c0_24, %c0_25] : memref<16x32xbf16, #tpu.memory_space<vmem>>, vector<16x32xbf16>
      %c0_26 = arith.constant 0 : index
      %c0_27 = arith.constant 0 : index
      %41 = vector.load %arg3[%c0_26, %c0_27] : memref<32x32xbf16, #tpu.memory_space<vmem>>, vector<32x32xbf16>
      %cst_28 = arith.constant dense<0.000000e+00> : vector<16x32xf32>
      %42 = tpu.matmul %40, %41, %cst_28 {dimension_numbers = #tpu.dot_dimension_numbers<[1], [0], [0], [1], [0, 0, 1, 1], [], []>} : vector<16x32xbf16>, vector<32x32xbf16>, vector<16x32xf32> -> vector<16x32xf32>
      %c0_29 = arith.constant 0 : index
      %c0_30 = arith.constant 0 : index
      %43 = vector.load %arg4[%c0_29, %c0_30] : memref<1x32xf32, #tpu.memory_space<vmem>>, vector<1x32xf32>
      %44 = vector.broadcast %43 : vector<1x32xf32> to vector<16x32xf32>
      %45 = arith.addf %42, %44 : vector<16x32xf32>
      %46 = arith.mulf %45, %45 : vector<16x32xf32>
      %47 = arith.mulf %45, %46 : vector<16x32xf32>
      %cst_31 = arith.constant 4.471500e-02 : f32
      %48 = vector.broadcast %cst_31 : f32 to vector<16x32xf32>
      %49 = arith.mulf %48, %47 : vector<16x32xf32>
      %50 = arith.addf %45, %49 : vector<16x32xf32>
      %cst_32 = arith.constant 0.797884583 : f32
      %51 = vector.broadcast %cst_32 : f32 to vector<16x32xf32>
      %52 = arith.mulf %51, %50 : vector<16x32xf32>
      %53 = math.tanh %52 : vector<16x32xf32>
      %cst_33 = arith.constant 1.000000e+00 : f32
      %54 = vector.broadcast %cst_33 : f32 to vector<16x32xf32>
      %55 = arith.addf %54, %53 : vector<16x32xf32>
      %cst_34 = arith.constant 5.000000e-01 : f32
      %56 = vector.broadcast %cst_34 : f32 to vector<16x32xf32>
      %57 = arith.mulf %56, %55 : vector<16x32xf32>
      %58 = arith.mulf %45, %57 : vector<16x32xf32>
      %59 = arith.truncf %58 : vector<16x32xf32> to vector<16x32xbf16>
      %c0_35 = arith.constant 0 : index
      %c0_36 = arith.constant 0 : index
      %60 = vector.load %arg9[%c0_35, %c0_36] : memref<16x32xbf16, #tpu.memory_space<vmem>>, vector<16x32xbf16>
      tpu.vector_store %arg9[%c0_35, %c0_36], %59 {strides = array<i32>} : memref<16x32xbf16, #tpu.memory_space<vmem>>, vector<16x32xbf16>,
      %cst_37 = arith.constant 0xFF800000 : f32
      %61 = vector.broadcast %cst_37 : f32 to vector<16x1xf32>
      %c0_38 = arith.constant 0 : index
      %c0_39 = arith.constant 0 : index
      %62 = vector.load %arg10[%c0_38, %c0_39] : memref<16x1xf32, #tpu.memory_space<vmem>>, vector<16x1xf32>
      tpu.vector_store %arg10[%c0_38, %c0_39], %61 {strides = array<i32>} : memref<16x1xf32, #tpu.memory_space<vmem>>, vector<16x1xf32>,
      %c0_i32_40 = arith.constant 0 : i32
      %63 = vector.broadcast %c0_i32_40 : i32 to vector<16x1xi32>
      %c0_41 = arith.constant 0 : index
      %c0_42 = arith.constant 0 : index
      %64 = vector.load %arg11[%c0_41, %c0_42] : memref<16x1xi32, #tpu.memory_space<vmem>>, vector<16x1xi32>
      tpu.vector_store %arg11[%c0_41, %c0_42], %63 {strides = array<i32>} : memref<16x1xi32, #tpu.memory_space<vmem>>, vector<16x1xi32>,
    } else {
    }
    %c0 = arith.constant 0 : index
    %c0_1 = arith.constant 0 : index
    %3 = vector.load %arg9[%c0, %c0_1] : memref<16x32xbf16, #tpu.memory_space<vmem>>, vector<16x32xbf16>
    %c0_2 = arith.constant 0 : index
    %c0_3 = arith.constant 0 : index
    %4 = vector.load %arg5[%c0_2, %c0_3] : memref<32x128xbf16, #tpu.memory_space<vmem>>, vector<32x128xbf16>
    %cst = arith.constant dense<0.000000e+00> : vector<16x128xf32>
    %5 = tpu.matmul %3, %4, %cst {dimension_numbers = #tpu.dot_dimension_numbers<[1], [0], [0], [1], [0, 0, 1, 1], [], []>} : vector<16x32xbf16>, vector<32x128xbf16>, vector<16x128xf32> -> vector<16x128xf32>
    %c0_4 = arith.constant 0 : index
    %c0_5 = arith.constant 0 : index
    %6 = vector.load %arg6[%c0_4, %c0_5] : memref<1x128xf32, #tpu.memory_space<vmem>>, vector<1x128xf32>
    %7 = vector.broadcast %6 : vector<1x128xf32> to vector<16x128xf32>
    %8 = arith.addf %5, %7 : vector<16x128xf32>
    %9 = arith.truncf %8 : vector<16x128xf32> to vector<16x128xbf16>
    %c0_6 = arith.constant 0 : index
    %c0_7 = arith.constant 0 : index
    %10 = vector.load %arg7[%c0_6, %c0_7] : memref<16x128xbf16, #tpu.memory_space<vmem>>, vector<16x128xbf16>
    tpu.vector_store %arg7[%c0_6, %c0_7], %9 {strides = array<i32>} : memref<16x128xbf16, #tpu.memory_space<vmem>>, vector<16x128xbf16>,
    %11 = tpu.iota {dimensions = array<i32: 1>} : vector<16x128xi32>
    %c128_i32 = arith.constant 128 : i32
    %12 = arith.muli %arg1, %c128_i32 : i32
    %13 = vector.broadcast %12 : i32 to vector<16x128xi32>
    %14 = arith.addi %11, %13 : vector<16x128xi32>
    %c64_i32 = arith.constant 64 : i32
    %15 = vector.broadcast %c64_i32 : i32 to vector<16x128xi32>
    %16 = arith.cmpi slt, %14, %15 : vector<16x128xi32>
    %cst_8 = arith.constant 0xFF800000 : f32
    %17 = vector.broadcast %cst_8 : f32 to vector<16x128xf32>
    %18 = arith.select %16, %8, %17 : vector<16x128xi1>, vector<16x128xf32>
    %cst_9 = arith.constant dense<0xFF800000> : vector<16xf32>
    %19 = vector.multi_reduction <maximumf>, %18, %cst_9 [1] : vector<16x128xf32> to vector<16xf32>
    %20 = vector.shape_cast %19 : vector<16xf32> to vector<16x1xf32>
    %21 = vector.broadcast %20 : vector<16x1xf32> to vector<16x128xf32>
    %22 = arith.cmpf oeq, %18, %21 : vector<16x128xf32>
    %23 = arith.sitofp %14 : vector<16x128xi32> to vector<16x128xf32>
    %cst_10 = arith.constant 1.000000e+30 : f32
    %24 = vector.broadcast %cst_10 : f32 to vector<16x128xf32>
    %25 = arith.select %22, %23, %24 : vector<16x128xi1>, vector<16x128xf32>
    %cst_11 = arith.constant dense<0x7F800000> : vector<16xf32>
    %26 = vector.multi_reduction <minimumf>, %25, %cst_11 [1] : vector<16x128xf32> to vector<16xf32>
    %27 = vector.shape_cast %26 : vector<16xf32> to vector<16x1xf32>
    %28 = arith.fptosi %27 : vector<16x1xf32> to vector<16x1xi32>
    %c0_12 = arith.constant 0 : index
    %c0_13 = arith.constant 0 : index
    %29 = vector.load %arg10[%c0_12, %c0_13] : memref<16x1xf32, #tpu.memory_space<vmem>>, vector<16x1xf32>
    %30 = arith.cmpf ogt, %20, %29 : vector<16x1xf32>
    %c0_14 = arith.constant 0 : index
    %c0_15 = arith.constant 0 : index
    %31 = vector.load %arg11[%c0_14, %c0_15] : memref<16x1xi32, #tpu.memory_space<vmem>>, vector<16x1xi32>
    %32 = arith.select %30, %28, %31 : vector<16x1xi1>, vector<16x1xi32>
    %c0_16 = arith.constant 0 : index
    %c0_17 = arith.constant 0 : index
    %33 = vector.load %arg11[%c0_16, %c0_17] : memref<16x1xi32, #tpu.memory_space<vmem>>, vector<16x1xi32>
    tpu.vector_store %arg11[%c0_16, %c0_17], %32 {strides = array<i32>} : memref<16x1xi32, #tpu.memory_space<vmem>>, vector<16x1xi32>,
    %c0_18 = arith.constant 0 : index
    %c0_19 = arith.constant 0 : index
    %34 = vector.load %arg10[%c0_18, %c0_19] : memref<16x1xf32, #tpu.memory_space<vmem>>, vector<16x1xf32>
    %35 = arith.maximumf %20, %34 : vector<16x1xf32>
    %c0_20 = arith.constant 0 : index
    %c0_21 = arith.constant 0 : index
    %36 = vector.load %arg10[%c0_20, %c0_21] : memref<16x1xf32, #tpu.memory_space<vmem>>, vector<16x1xf32>
    tpu.vector_store %arg10[%c0_20, %c0_21], %35 {strides = array<i32>} : memref<16x1xf32, #tpu.memory_space<vmem>>, vector<16x1xf32>,
    %c0_i32_22 = arith.constant 0 : i32
    %37 = arith.cmpi eq, %arg1, %c0_i32_22 : i32
    %38 = arith.extui %37 : i1 to i32
    %c0_i32_23 = arith.constant 0 : i32
    %39 = arith.cmpi ne, %38, %c0_i32_23 : i32
    scf.if %39 {
      %c0_24 = arith.constant 0 : index
      %c0_25 = arith.constant 0 : index
      %40 = vector.load %arg11[%c0_24, %c0_25] : memref<16x1xi32, #tpu.memory_space<vmem>>, vector<16x1xi32>
      %c0_26 = arith.constant 0 : index
      %c0_27 = arith.constant 0 : index
      %41 = vector.load %arg8[%c0_26, %c0_27] : memref<16x1xi32, #tpu.memory_space<vmem>>, vector<16x1xi32>
      tpu.vector_store %arg8[%c0_26, %c0_27], %40 {strides = array<i32>} : memref<16x1xi32, #tpu.memory_space<vmem>>, vector<16x1xi32>,
    } else {
    }
    return
  }
  func.func @transform_0(%arg0: i32, %arg1: i32) -> (i32, i32) {
    %c0_i32 = arith.constant 0 : i32
    %c0_i32_0 = arith.constant 0 : i32
    return %arg0, %c0_i32 : i32, i32
  }
  func.func @transform_1(%arg0: i32, %arg1: i32) -> (i32, i32) {
    %c0_i32 = arith.constant 0 : i32
    %c0_i32_0 = arith.constant 0 : i32
    %c0_i32_1 = arith.constant 0 : i32
    return %c0_i32, %c0_i32_0 : i32, i32
  }
  func.func @transform_2(%arg0: i32, %arg1: i32) -> (i32, i32) {
    %c0_i32 = arith.constant 0 : i32
    %c0_i32_0 = arith.constant 0 : i32
    %c0_i32_1 = arith.constant 0 : i32
    return %c0_i32, %c0_i32_0 : i32, i32
  }
  func.func @transform_3(%arg0: i32, %arg1: i32) -> (i32, i32) {
    %c0_i32 = arith.constant 0 : i32
    %c0_i32_0 = arith.constant 0 : i32
    return %c0_i32, %arg1 : i32, i32
  }
  func.func @transform_4(%arg0: i32, %arg1: i32) -> (i32, i32) {
    %c0_i32 = arith.constant 0 : i32
    %c0_i32_0 = arith.constant 0 : i32
    return %c0_i32, %arg1 : i32, i32
  }
  func.func @transform_5(%arg0: i32, %arg1: i32) -> (i32, i32) {
    %c0_i32 = arith.constant 0 : i32
    return %arg0, %arg1 : i32, i32
  }
  func.func @transform_6(%arg0: i32, %arg1: i32) -> (i32, i32) {
    %c0_i32 = arith.constant 0 : i32
    %c0_i32_0 = arith.constant 0 : i32
    return %arg0, %c0_i32 : i32, i32
  }
}

</mosaic_0001>

<bundles_post_ra>
// kernel: tpu_custom_call.1
= control target key start
LH: loop header
LB: loop body
LE: loop exit
PB: predicated region body
PF: predicated region fallthrough
CT: control target
= control target key end

     0   :  { %12 = vsyncpa [#allocation6], 0  ;;  %s754_s0 = inlined_call_operand.hbm [shape: bf16[16,32], index: 0, kind: input, shape index: {}]   ;;  %s755_s1 = inlined_call_operand.hbm [shape: bf16[32,32], index: 1, kind: input, shape index: {}]   ;;  %s756_s2 = inlined_call_operand.hbm [shape: f32[1,32], index: 2, kind: input, shape index: {}]   ;;  %s757_s3 = inlined_call_operand.hbm [shape: bf16[32,128], index: 3, kind: input, shape index: {}]   ;;  %s758_s4 = inlined_call_operand.hbm [shape: f32[1,128], index: 4, kind: input, shape index: {}]   ;;  %s759_s5 = inlined_call_operand.hbm [shape: bf16[16,128], index: 5, kind: output, shape index: {0}]   ;;  %s760_s6 = inlined_call_operand.hbm [shape: s32[16,1], index: 6, kind: output, shape index: {1}]  }
   0x1   :  { %13 = vsyncpa [#allocation9], 0 }
   0x2   :  { %14 = vsyncpa [#allocation12], 0 }
   0x3   :  { %15 = vsyncpa [#allocation7], 0 }
   0x4   :  { %16 = vsyncpa [#allocation16], 0  ;;  %s586_s21 = smov [#allocation8]   ;;  %s587_s23 = smov [#allocation11]  }
   0x5   :  { %s34_s22 = sshll.u32 %s586_s21, 4  ;;  %s56_s24 = sshll.u32 %s587_s23, 4  ;;  %s35_s22 = int_to_ptr.vmem [resolvable:$true] %s34_s22  ;;  %s636_s24 = int_to_ptr.vmem [resolvable:$true] %s56_s24 }
   0x6   :  { %s422_s27 = scalar_lea.hbm %s755_s1, 256 }
   0x7   :  { %p423_p0 = scmp.ne.s32.totalorder %s755_s1, %s422_s27  ;;  %p426_p1 = scmp.lt.u32.totalorder %s422_s27, %s755_s1 }
   0x9   :  { %p428_p2 = pnand %p426_p1, %p423_p0 }
   0xb   :  { %431 = shalt.err (!%p428_p2)
}
   0xc   :  { %s432_s8 = scalar_lea.vmem %s35_s22, 256  ;;  %p437_p4 = scmp.lt.s32.totalorder %s35_s22, %s35_s22 }
   0xd   :  { %p433_p3 = scmp.ne.s32.totalorder %s35_s22, %s432_s8  ;;  %p438_p5 = scmp.lt.s32.totalorder %s432_s8, %s432_s8 }
   0xf   :  { %p439_p6 = por %p438_p5, %p437_p4 }
  0x11   :  { %p440_p7 = pnand %p439_p6, %p433_p3 }
  0x13   :  { %443 = shalt.err (!%p440_p7)
}
  0x14   :  { %s588_s9 = smov 64   ;;  %s589_s10 = smov 4  }
  0x15   :  { %40 = dma.hbm_to_vmem [thread:$0]  %s755_s1, 256, %s35_s22, [#allocation9], %s588_s9, %s588_s9, %s589_s10  }
  0x16   :  { %s444_s15 = scalar_lea.hbm %s757_s3, 256 }
  0x17   :  { %p445_p8 = scmp.ne.s32.totalorder %s757_s3, %s444_s15  ;;  %p448_p9 = scmp.lt.u32.totalorder %s444_s15, %s757_s3 }
  0x19   :  { %p450_p10 = pnand %p448_p9, %p445_p8 }
  0x1b   :  { %453 = shalt.err (!%p450_p10)
}
  0x1c   :  { %s454_s20 = scalar_lea.vmem %s636_s24, 256  ;;  %p459_p12 = scmp.lt.s32.totalorder %s636_s24, %s636_s24 }
  0x1d   :  { %p455_p11 = scmp.ne.s32.totalorder %s636_s24, %s454_s20  ;;  %p460_p13 = scmp.lt.s32.totalorder %s454_s20, %s454_s20 }
  0x1f   :  { %p461_p0 = por %p460_p13, %p459_p12 }
  0x21   :  { %p462_p1 = pnand %p461_p0, %p455_p11 }
  0x23   :  { %465 = shalt.err (!%p462_p1)
}
  0x24   :  { %62 = dma.hbm_to_vmem [thread:$0]  %s757_s3, 256, %s636_s24, [#allocation12], %s588_s9, %s588_s9, %s589_s10  }
  0x25   :  { %s590_s22 = smov [#allocation5]   ;;  %s591_s25 = smov [#allocation10]  }
  0x26   :  { %s22_s23 = sshll.u32 %s590_s22, 4  ;;  %s47_s26 = sshll.u32 %s591_s25, 4  ;;  %s23_s23 = int_to_ptr.vmem [resolvable:$true] %s22_s23  ;;  %s48_s26 = int_to_ptr.vmem [resolvable:$true] %s47_s26 }
  0x27   :  { %s466_s29 = scalar_lea.hbm %s754_s0, 128 }
  0x28   :  { %p467_p2 = scmp.ne.s32.totalorder %s754_s0, %s466_s29  ;;  %p470_p3 = scmp.lt.u32.totalorder %s466_s29, %s754_s0 }
  0x2a   :  { %p472_p4 = pnand %p470_p3, %p467_p2 }
  0x2c   :  { %475 = shalt.err (!%p472_p4)
}
  0x2d   :  { %s476_s3 = scalar_lea.vmem %s23_s23, 128  ;;  %p481_p6 = scmp.lt.s32.totalorder %s23_s23, %s23_s23 }
  0x2e   :  { %p477_p5 = scmp.ne.s32.totalorder %s23_s23, %s476_s3  ;;  %p482_p7 = scmp.lt.s32.totalorder %s476_s3, %s476_s3 }
  0x30   :  { %p483_p8 = por %p482_p7, %p481_p6 }
  0x32   :  { %p484_p9 = pnand %p483_p8, %p477_p5 }
  0x34   :  { %487 = shalt.err (!%p484_p9)
}
  0x35   :  { %28 = dma.hbm_to_vmem [thread:$0]  %s754_s0, 128, %s23_s23, [#allocation6], %s588_s9, %s588_s9, %s589_s10  }
  0x36   :  { %s488_s15 = scalar_lea.hbm %s756_s2, 16 }
  0x37   :  { %p489_p10 = scmp.ne.s32.totalorder %s756_s2, %s488_s15  ;;  %p492_p11 = scmp.lt.u32.totalorder %s488_s15, %s756_s2 }
  0x39   :  { %p494_p12 = pnand %p492_p11, %p489_p10 }
  0x3b   :  { %497 = shalt.err (!%p494_p12)
}
  0x3c   :  { %s498_s20 = scalar_lea.vmem %s48_s26, 16  ;;  %s502_s1 = scalar_lea.vmem %s48_s26, 32 }
  0x3d   :  { %p499_p13 = scmp.ne.s32.totalorder %s48_s26, %s498_s20  ;;  %p503_p0 = scmp.lt.s32.totalorder %s48_s26, %s48_s26 }
  0x3e   :  { %p504_p1 = scmp.lt.s32.totalorder %s502_s1, %s498_s20 }
  0x40   :  { %p505_p2 = por %p504_p1, %p503_p0 }
  0x42   :  { %p506_p3 = pnand %p505_p2, %p499_p13 }
  0x44   :  { %509 = shalt.err (!%p506_p3)
}
  0x45   :  { %50 = dma.hbm_to_vmem [thread:$0]  %s756_s2, 16, %s48_s26, [#allocation9]  }
  0x46   :  { %s592_s22 = smov [#allocation13]   ;;  %s510_s28 = scalar_lea.hbm %s758_s4, 16 }
  0x47   :  { %s69_s23 = sshll.u32 %s592_s22, 4  ;;  %p511_p4 = scmp.ne.s32.totalorder %s758_s4, %s510_s28  ;;  %s70_s23 = int_to_ptr.vmem [resolvable:$true] %s69_s23 }
  0x48   :  { %p514_p5 = scmp.lt.u32.totalorder %s510_s28, %s758_s4 }
  0x4a   :  { %p516_p6 = pnand %p514_p5, %p511_p4 }
  0x4c   :  { %519 = shalt.err (!%p516_p6)
}
  0x4d   :  { %s520_s11 = scalar_lea.vmem %s70_s23, 16  ;;  %s524_s2 = scalar_lea.vmem %s70_s23, 32 }
  0x4e   :  { %p521_p7 = scmp.ne.s32.totalorder %s70_s23, %s520_s11  ;;  %p525_p8 = scmp.lt.s32.totalorder %s70_s23, %s70_s23 }
  0x4f   :  { %p526_p9 = scmp.lt.s32.totalorder %s524_s2, %s520_s11 }
  0x51   :  { %p527_p10 = por %p526_p9, %p525_p8 }
  0x53   :  { %p528_p11 = pnand %p527_p10, %p521_p7 }
  0x55   :  { %531 = shalt.err (!%p528_p11)
}
  0x56   :  { %72 = dma.hbm_to_vmem [thread:$0]  %s758_s4, 16, %s70_s23, [#allocation12]  }
  0x57   :  { %576 = dma.done.wait [#allocation6], 128  }
  0x58   :  { %577 = vsyncadd [#allocation6], 4294967168 }
  0x59   :  { %578 = dma.done.wait [#allocation9], 272  }
  0x5a   :  { %579 = vsyncadd [#allocation9], 4294967024 }
  0x5b   :  { %580 = dma.done.wait [#allocation12], 272  }
  0x5c   :  { %581 = vsyncadd [#allocation12], 4294967024  ;;  %v593_v0 = vmov 0.0   ;;  %vm594_vm0 = vmmov 0   ;;  %v413_v1 = vld [vmem:[#allocation8] sm:$0xff]   ;;  %v414_v2 = vld [vmem:[#allocation8 + $0x8] sm:$0xff]   ;;  %v272_v34 = vlaneseq }
  0x5d   :  { %378 = vmatprep.subr.bf16.mxu0 %v593_v0  ;;  %382 = vmatprep.mubr.msk.bf16.mxu0 %vm594_vm0, %v593_v0  ;;  %v415_v3 = vld [vmem:[#allocation5] sm:$0xff]   ;;  %vm123_vm1 = vcmask 261120   ;;  %v354_v6 = vld [vmem:[#allocation10] ss:$0 sm:$0xff]  ;;  %vm188_vm2 = vcmask 7168   ;;  %v595_v33 = vmov -inf  }
  0x5e   :  { %386 = vmatprep.subr.bf16.mxu1 %v593_v0  ;;  %390 = vmatprep.mubr.msk.bf16.mxu1 %vm594_vm0, %v593_v0  ;;  %v416_v4 = vld [vmem:[#allocation11] sm:$0xff]   ;;  %v417_v5 = vld [vmem:[#allocation11 + $0x8] sm:$0xff]   ;;  %189 = vst.msk [vmem:[#allocation3] sm:$0xff] %vm188_vm2, %v595_v33  ;;  %190 = vst.msk [vmem:[#allocation3 + $0x8] sm:$0xff] %vm188_vm2, %v595_v33  ;;  %v273_v35 = vand.u32 127, %v272_v34  ;;  %v596_v46 = vmov 0  }
  0x5f   :  { %379 = vmatpush3.bf16.msra.mxu0 %v413_v1  ;;  %387 = vmatpush3.bf16.msra.mxu1 %v416_v4  ;;  %v359_v36 = vld [vmem:[#allocation13] ss:$0 sm:$0xff]  ;;  %191 = vst.msk [vmem:[#allocation4] sm:$0xff] %vm188_vm2, %v596_v46  ;;  %192 = vst.msk [vmem:[#allocation4 + $0x8] sm:$0xff] %vm188_vm2, %v596_v46  ;;  %s597_s4 = smov [#allocation14]  }
  0x60   :  { %380 = vmatprep.subr.bf16.mxu0 %v593_v0  ;;  %388 = vmatprep.subr.bf16.mxu1 %v593_v0  ;;  %vm277_vm3 = vcmp.lt.s32.totalorder %v273_v35, 64  ;;  %v286_v48 = vcvt.s32.f32 %v273_v35  ;;  %s324_s24 = sshll.u32 %s597_s4, 4  ;;  %s325_s24 = int_to_ptr.vmem [resolvable:$true] %s324_s24 }
  0x61   :  { %s532_s12 = scalar_lea.vmem %s325_s24, 128  ;;  %p537_p13 = scmp.lt.s32.totalorder %s325_s24, %s325_s24 }
  0x62   :  { %p533_p12 = scmp.ne.s32.totalorder %s325_s24, %s532_s12  ;;  %p538_p0 = scmp.lt.s32.totalorder %s532_s12, %s532_s12 }
  0x63   :  { %381 = vmatpush3.bf16.msra.mxu0 %v414_v2  ;;  %389 = vmatpush3.bf16.msra.mxu1 %v417_v5 }
  0x64   :  { %p539_p1 = por %p538_p0, %p537_p13 }
  0x65   :  { %v295_v47 = vld [vmem:[#allocation3] sm:$0xff]  ;;  %v296_v52 = vld [vmem:[#allocation3 + $0x8] sm:$0xff] }
  0x66   :  { %383 = vmatmul.mubr.msk.bf16.vlgmr.msra.gmra.mrb[0].mxu0 %vm123_vm1, %v415_v3  ;;  %p540_p2 = pnand %p539_p1, %p533_p12 }
 0x139   :  { %v161_v7 = vpop.f32.mrb[0].mxu0 }
 0x13a   :  { %v162_v8 = vadd.f32 %v354_v6, %v161_v7  ;;  %v384_v9 = vpop.f32.mrb[1].mxu0 }
 0x13b   :  { %v164_v10 = vpop.f32.mrb[2].mxu0 }
 0x13c   :  { %v168_v11 = vmul.f32 %v162_v8, %v162_v8  ;;  %v165_v12 = vadd.f32 %v354_v6, %v164_v10  ;;  %v385_v13 = vpop.f32.mrb[3].mxu0 }
 0x13e   :  { %v170_v14 = vmul.f32 %v168_v11, %v162_v8  ;;  %v169_v15 = vmul.f32 %v165_v12, %v165_v12 }
 0x140   :  { %v172_v16 = vmul.f32 0.044715, %v170_v14  ;;  %v171_v17 = vmul.f32 %v169_v15, %v165_v12 }
 0x142   :  { %v174_v18 = vadd.f32 %v172_v16, %v162_v8  ;;  %v173_v19 = vmul.f32 0.044715, %v171_v17 }
 0x144   :  { %v176_v20 = vmul.f32 0.7978846, %v174_v18  ;;  %v175_v21 = vadd.f32 %v173_v19, %v165_v12 }
 0x146   :  { %418 = vtanh.f32 %v176_v20  ;;  %v177_v22 = vmul.f32 0.7978846, %v175_v21 }
 0x148   :  { %420 = vtanh.f32 %v177_v22 }
 0x150   :  { %v419_v23 = vpop.eup %418 }
 0x151   :  { %v180_v24 = vadd.f32 1.0, %v419_v23 }
 0x152   :  { %v421_v25 = vpop.eup %420 }
 0x153   :  { %v182_v26 = vmul.f32 0.5, %v180_v24  ;;  %v181_v27 = vadd.f32 1.0, %v421_v25 }
 0x155   :  { %v183_v28 = vmul.f32 0.5, %v181_v27  ;;  %v184_v29 = vmul.f32 %v182_v26, %v162_v8 }
 0x157   :  { %v185_v30 = vmul.f32 %v183_v28, %v165_v12 }
 0x159   :  { %v186_v31 = vpack.c.bf16 %v185_v30, %v184_v29 }
 0x15b   :  { %187 = vst.msk [vmem:[#allocation2] sm:$0xff] %vm123_vm1, %v186_v31 }
 0x162   :  { %v193_v32 = vld [vmem:[#allocation2] sm:$0xff] }
 0x163   :  { %391 = vmatmul.mubr.msk.bf16.vlgmr.msra.gmra.mrb[0].mxu1 %vm123_vm1, %v193_v32 }
 0x236   :  { %v255_v37 = vpop.f32.mrb[0].mxu1 }
 0x237   :  { %v256_v38 = vadd.f32 %v359_v36, %v255_v37  ;;  %v392_v39 = vpop.f32.mrb[1].mxu1 }
 0x238   :  { %v258_v40 = vpop.f32.mrb[2].mxu1 }
 0x239   :  { %v259_v41 = vadd.f32 %v359_v36, %v258_v40  ;;  %v393_v42 = vpop.f32.mrb[3].mxu1  ;;  %v278_v43 = vsel %vm277_vm3, %v256_v38, -inf }
 0x23a   :  { %280 = vmax.xlane.f32.xlu0 %v278_v43 }
 0x23b   :  { %v370_v44 = vpack.c.bf16 %v259_v41, %v256_v38  ;;  %v279_v45 = vsel %vm277_vm3, %v259_v41, -inf }
 0x23d   :  { %371 = vst [vmem:[#allocation14] sm:$0xff] %v370_v44  }
 0x23e   :  { %282 = vmax.xlane.f32.xlu0 %v279_v45 }
 0x2c7   :  { %v281_v49 = vpop.xlane.xlu0 %280 }
 0x2c8   :  { %vm297_vm4 = vcmp.gt.f32.partialorder %v281_v49, %v295_v47  ;;  %v308_v50 = vmax.f32 %v281_v49, %v295_v47  ;;  %vm284_vm5 = vcmp.eq.f32.partialorder %v278_v43, %v281_v49 }
 0x2c9   :  { %v287_v51 = vsel %vm284_vm5, %v286_v48, 1e+30 }
 0x2ca   :  { %310 = vst.msk [vmem:[#allocation3] sm:$0xff] %vm188_vm2, %v308_v50  ;;  %289 = vmin.xlane.f32.xlu1 %v287_v51 }
 0x2cb   :  { %v283_v53 = vpop.xlane.xlu0 %282 }
 0x2cc   :  { %vm298_vm6 = vcmp.gt.f32.partialorder %v283_v53, %v296_v52  ;;  %v309_v54 = vmax.f32 %v283_v53, %v296_v52  ;;  %vm285_vm7 = vcmp.eq.f32.partialorder %v279_v45, %v283_v53 }
 0x2cd   :  { %v288_v55 = vsel %vm285_vm7, %v286_v48, 1e+30 }
 0x2ce   :  { %311 = vst.msk [vmem:[#allocation3 + $0x8] sm:$0xff] %vm188_vm2, %v309_v54  ;;  %291 = vmin.xlane.f32.xlu1 %v288_v55 }
 0x2cf   :  { %543 = shalt.err (!%p540_p2)
}
 0x2d0   :  { %s544_s15 = scalar_lea.hbm %s759_s5, 128 }
 0x2d1   :  { %p545_p3 = scmp.ne.s32.totalorder %s759_s5, %s544_s15  ;;  %p548_p4 = scmp.lt.u32.totalorder %s544_s15, %s759_s5 }
 0x2d3   :  { %p550_p5 = pnand %p548_p4, %p545_p3 }
 0x2d5   :  { %553 = shalt.err (!%p550_p5)
}
 0x2d6   :  { %330 = dma.vmem_to_hbm [thread:$0]  %s325_s24, 128, %s759_s5, [#allocation7], %s588_s9, %s588_s9, %s589_s10   ;;  %v299_v58 = vld [vmem:[#allocation4] sm:$0xff]  ;;  %v300_v63 = vld [vmem:[#allocation4 + $0x8] sm:$0xff] }
 0x2d7   :  { %s598_s0 = smov [#allocation15]  }
 0x2d8   :  { %s336_s21 = sshll.u32 %s598_s0, 4  ;;  %s337_s21 = int_to_ptr.vmem [resolvable:$true] %s336_s21 }
 0x2d9   :  { %s554_s5 = scalar_lea.vmem %s337_s21, 256  ;;  %p559_p7 = scmp.lt.s32.totalorder %s337_s21, %s337_s21 }
 0x2da   :  { %p555_p6 = scmp.ne.s32.totalorder %s337_s21, %s554_s5  ;;  %p560_p8 = scmp.lt.s32.totalorder %s554_s5, %s554_s5 }
 0x2dc   :  { %p561_p9 = por %p560_p8, %p559_p7 }
 0x2de   :  { %p562_p10 = pnand %p561_p9, %p555_p6 }
 0x357   :  { %v290_v56 = vpop.xlane.xlu1 %289 }
 0x358   :  { %v394_v57 = vtrunc.f32 %v290_v56 }
 0x35a   :  { %v395_v59 = vcvt.f32.s32 %v394_v57 }
 0x35b   :  { %v292_v60 = vpop.xlane.xlu1 %291 }
 0x35c   :  { %v301_v61 = vsel %vm297_vm4, %v395_v59, %v299_v58  ;;  %v396_v62 = vtrunc.f32 %v292_v60 }
 0x35d   :  { %304 = vst.msk [vmem:[#allocation4] sm:$0xff] %vm188_vm2, %v301_v61 }
 0x35e   :  { %v397_v0 = vcvt.f32.s32 %v396_v62 }
 0x360   :  { %v302_v1 = vsel %vm298_vm6, %v397_v0, %v300_v63 }
 0x361   :  { %305 = vst.msk [vmem:[#allocation4 + $0x8] sm:$0xff] %vm188_vm2, %v302_v1 }
 0x364   :  { %v315_v2 = vld [vmem:[#allocation4] sm:$0xff] }
 0x365   :  { %317 = vst.msk [vmem:[#allocation15] sm:$0xff] %vm188_vm2, %v315_v2 }
 0x368   :  { %v316_v3 = vld [vmem:[#allocation4 + $0x8] sm:$0xff] }
 0x369   :  { %318 = vst.msk [vmem:[#allocation15 + $0x8] sm:$0xff] %vm188_vm2, %v316_v3 }
 0x36a   :  { %565 = shalt.err (!%p562_p10)
}
 0x36b   :  { %s566_s22 = scalar_lea.hbm %s760_s6, 256 }
 0x36c   :  { %p567_p11 = scmp.ne.s32.totalorder %s760_s6, %s566_s22  ;;  %p570_p12 = scmp.lt.u32.totalorder %s566_s22, %s760_s6 }
 0x36e   :  { %p572_p13 = pnand %p570_p12, %p567_p11 }
 0x370   :  { %575 = shalt.err (!%p572_p13)
}
 0x371   :  { %s599_s29 = smov 128   ;;  %s600_s30 = smov 8  }
 0x372   :  { %342 = dma.vmem_to_hbm [thread:$0]  %s337_s21, 256, %s760_s6, [#allocation16], %s599_s29, %s599_s29, %s600_s30  }
 0x373   :  { %582 = dma.done.wait [#allocation7], 128  }
 0x374   :  { %583 = vsyncadd [#allocation7], 4294967168 }
 0x375   :  { %584 = dma.done.wait [#allocation16], 256  }
 0x376   :  { %585 = vsyncadd [#allocation16], 4294967040 }
 0x377   :  { %349 = vsyncpa [#allocation6], 1 }
 0x378   :  { %350 = vsyncpa [#allocation9], 1 }
 0x379   :  { %351 = vsyncpa [#allocation12], 1 }
 0x37a   :  { %352 = vsyncpa [#allocation7], 1 }
 0x37b   :  { %353 = vsyncpa [#allocation16], 1 }

// kernel: tpu_custom_call.1
= control target key start
LH: loop header
LB: loop body
LE: loop exit
PB: predicated region body
PF: predicated region fallthrough
CT: control target
= control target key end

     0   :  { %12 = vsyncpa [#allocation6], 0  ;;  %s754_s0 = inlined_call_operand.hbm [shape: bf16[16,32], index: 0, kind: input, shape index: {}]   ;;  %s755_s1 = inlined_call_operand.hbm [shape: bf16[32,32], index: 1, kind: input, shape index: {}]   ;;  %s756_s2 = inlined_call_operand.hbm [shape: f32[1,32], index: 2, kind: input, shape index: {}]   ;;  %s757_s3 = inlined_call_operand.hbm [shape: bf16[32,128], index: 3, kind: input, shape index: {}]   ;;  %s758_s4 = inlined_call_operand.hbm [shape: f32[1,128], index: 4, kind: input, shape index: {}]   ;;  %s759_s5 = inlined_call_operand.hbm [shape: bf16[16,128], index: 5, kind: output, shape index: {0}]   ;;  %s760_s6 = inlined_call_operand.hbm [shape: s32[16,1], index: 6, kind: output, shape index: {1}]  }
   0x1   :  { %13 = vsyncpa [#allocation9], 0 }
   0x2   :  { %14 = vsyncpa [#allocation12], 0 }
   0x3   :  { %15 = vsyncpa [#allocation7], 0 }
   0x4   :  { %16 = vsyncpa [#allocation16], 0  ;;  %s586_s21 = smov [#allocation8]   ;;  %s587_s23 = smov [#allocation11]  }
   0x5   :  { %s34_s22 = sshll.u32 %s586_s21, 4  ;;  %s56_s24 = sshll.u32 %s587_s23, 4  ;;  %s35_s22 = int_to_ptr.vmem [resolvable:$true] %s34_s22  ;;  %s636_s24 = int_to_ptr.vmem [resolvable:$true] %s56_s24 }
   0x6   :  { %s422_s27 = scalar_lea.hbm %s755_s1, 256 }
   0x7   :  { %p423_p0 = scmp.ne.s32.totalorder %s755_s1, %s422_s27  ;;  %p426_p1 = scmp.lt.u32.totalorder %s422_s27, %s755_s1 }
   0x9   :  { %p428_p2 = pnand %p426_p1, %p423_p0 }
   0xb   :  { %431 = shalt.err (!%p428_p2)
}
   0xc   :  { %s432_s8 = scalar_lea.vmem %s35_s22, 256  ;;  %p437_p4 = scmp.lt.s32.totalorder %s35_s22, %s35_s22 }
   0xd   :  { %p433_p3 = scmp.ne.s32.totalorder %s35_s22, %s432_s8  ;;  %p438_p5 = scmp.lt.s32.totalorder %s432_s8, %s432_s8 }
   0xf   :  { %p439_p6 = por %p438_p5, %p437_p4 }
  0x11   :  { %p440_p7 = pnand %p439_p6, %p433_p3 }
  0x13   :  { %443 = shalt.err (!%p440_p7)
}
  0x14   :  { %s588_s9 = smov 64   ;;  %s589_s10 = smov 4  }
  0x15   :  { %40 = dma.hbm_to_vmem [thread:$0]  %s755_s1, 256, %s35_s22, [#allocation9], %s588_s9, %s588_s9, %s589_s10  }
  0x16   :  { %s444_s15 = scalar_lea.hbm %s757_s3, 256 }
  0x17   :  { %p445_p8 = scmp.ne.s32.totalorder %s757_s3, %s444_s15  ;;  %p448_p9 = scmp.lt.u32.totalorder %s444_s15, %s757_s3 }
  0x19   :  { %p450_p10 = pnand %p448_p9, %p445_p8 }
  0x1b   :  { %453 = shalt.err (!%p450_p10)
}
  0x1c   :  { %s454_s20 = scalar_lea.vmem %s636_s24, 256  ;;  %p459_p12 = scmp.lt.s32.totalorder %s636_s24, %s636_s24 }
  0x1d   :  { %p455_p11 = scmp.ne.s32.totalorder %s636_s24, %s454_s20  ;;  %p460_p13 = scmp.lt.s32.totalorder %s454_s20, %s454_s20 }
  0x1f   :  { %p461_p0 = por %p460_p13, %p459_p12 }
  0x21   :  { %p462_p1 = pnand %p461_p0, %p455_p11 }
  0x23   :  { %465 = shalt.err (!%p462_p1)
}
  0x24   :  { %62 = dma.hbm_to_vmem [thread:$0]  %s757_s3, 256, %s636_s24, [#allocation12], %s588_s9, %s588_s9, %s589_s10  }
  0x25   :  { %s590_s22 = smov [#allocation5]   ;;  %s591_s25 = smov [#allocation10]  }
  0x26   :  { %s22_s23 = sshll.u32 %s590_s22, 4  ;;  %s47_s26 = sshll.u32 %s591_s25, 4  ;;  %s23_s23 = int_to_ptr.vmem [resolvable:$true] %s22_s23  ;;  %s48_s26 = int_to_ptr.vmem [resolvable:$true] %s47_s26 }
  0x27   :  { %s466_s29 = scalar_lea.hbm %s754_s0, 128 }
  0x28   :  { %p467_p2 = scmp.ne.s32.totalorder %s754_s0, %s466_s29  ;;  %p470_p3 = scmp.lt.u32.totalorder %s466_s29, %s754_s0 }
  0x2a   :  { %p472_p4 = pnand %p470_p3, %p467_p2 }
  0x2c   :  { %475 = shalt.err (!%p472_p4)
}
  0x2d   :  { %s476_s3 = scalar_lea.vmem %s23_s23, 128  ;;  %p481_p6 = scmp.lt.s32.totalorder %s23_s23, %s23_s23 }
  0x2e   :  { %p477_p5 = scmp.ne.s32.totalorder %s23_s23, %s476_s3  ;;  %p482_p7 = scmp.lt.s32.totalorder %s476_s3, %s476_s3 }
  0x30   :  { %p483_p8 = por %p482_p7, %p481_p6 }
  0x32   :  { %p484_p9 = pnand %p483_p8, %p477_p5 }
  0x34   :  { %487 = shalt.err (!%p484_p9)
}
  0x35   :  { %28 = dma.hbm_to_vmem [thread:$0]  %s754_s0, 128, %s23_s23, [#allocation6], %s588_s9, %s588_s9, %s589_s10  }
  0x36   :  { %s488_s15 = scalar_lea.hbm %s756_s2, 16 }
  0x37   :  { %p489_p10 = scmp.ne.s32.totalorder %s756_s2, %s488_s15  ;;  %p492_p11 = scmp.lt.u32.totalorder %s488_s15, %s756_s2 }
  0x39   :  { %p494_p12 = pnand %p492_p11, %p489_p10 }
  0x3b   :  { %497 = shalt.err (!%p494_p12)
}
  0x3c   :  { %s498_s20 = scalar_lea.vmem %s48_s26, 16  ;;  %s502_s1 = scalar_lea.vmem %s48_s26, 32 }
  0x3d   :  { %p499_p13 = scmp.ne.s32.totalorder %s48_s26, %s498_s20  ;;  %p503_p0 = scmp.lt.s32.totalorder %s48_s26, %s48_s26 }
  0x3e   :  { %p504_p1 = scmp.lt.s32.totalorder %s502_s1, %s498_s20 }
  0x40   :  { %p505_p2 = por %p504_p1, %p503_p0 }
  0x42   :  { %p506_p3 = pnand %p505_p2, %p499_p13 }
  0x44   :  { %509 = shalt.err (!%p506_p3)
}
  0x45   :  { %50 = dma.hbm_to_vmem [thread:$0]  %s756_s2, 16, %s48_s26, [#allocation9]  }
  0x46   :  { %s592_s22 = smov [#allocation13]   ;;  %s510_s28 = scalar_lea.hbm %s758_s4, 16 }
  0x47   :  { %s69_s23 = sshll.u32 %s592_s22, 4  ;;  %p511_p4 = scmp.ne.s32.totalorder %s758_s4, %s510_s28  ;;  %s70_s23 = int_to_ptr.vmem [resolvable:$true] %s69_s23 }
  0x48   :  { %p514_p5 = scmp.lt.u32.totalorder %s510_s28, %s758_s4 }
  0x4a   :  { %p516_p6 = pnand %p514_p5, %p511_p4 }
  0x4c   :  { %519 = shalt.err (!%p516_p6)
}
  0x4d   :  { %s520_s11 = scalar_lea.vmem %s70_s23, 16  ;;  %s524_s2 = scalar_lea.vmem %s70_s23, 32 }
  0x4e   :  { %p521_p7 = scmp.ne.s32.totalorder %s70_s23, %s520_s11  ;;  %p525_p8 = scmp.lt.s32.totalorder %s70_s23, %s70_s23 }
  0x4f   :  { %p526_p9 = scmp.lt.s32.totalorder %s524_s2, %s520_s11 }
  0x51   :  { %p527_p10 = por %p526_p9, %p525_p8 }
  0x53   :  { %p528_p11 = pnand %p527_p10, %p521_p7 }
  0x55   :  { %531 = shalt.err (!%p528_p11)
}
  0x56   :  { %72 = dma.hbm_to_vmem [thread:$0]  %s758_s4, 16, %s70_s23, [#allocation12]  }
  0x57   :  { %576 = dma.done.wait [#allocation6], 128  }
  0x58   :  { %577 = vsyncadd [#allocation6], 4294967168 }
  0x59   :  { %578 = dma.done.wait [#allocation9], 272  }
  0x5a   :  { %579 = vsyncadd [#allocation9], 4294967024 }
  0x5b   :  { %580 = dma.done.wait [#allocation12], 272  }
  0x5c   :  { %581 = vsyncadd [#allocation12], 4294967024  ;;  %v593_v0 = vmov 0.0   ;;  %vm594_vm0 = vmmov 0   ;;  %v413_v1 = vld [vmem:[#allocation8] sm:$0xff]   ;;  %v414_v2 = vld [vmem:[#allocation8 + $0x8] sm:$0xff]   ;;  %v272_v34 = vlaneseq }
  0x5d   :  { %378 = vmatprep.subr.bf16.mxu0 %v593_v0  ;;  %382 = vmatprep.mubr.msk.bf16.mxu0 %vm594_vm0, %v593_v0  ;;  %v415_v3 = vld [vmem:[#allocation5] sm:$0xff]   ;;  %vm123_vm1 = vcmask 261120   ;;  %v354_v6 = vld [vmem:[#allocation10] ss:$0 sm:$0xff]  ;;  %vm188_vm2 = vcmask 7168   ;;  %v595_v33 = vmov -inf  }
  0x5e   :  { %386 = vmatprep.subr.bf16.mxu1 %v593_v0  ;;  %390 = vmatprep.mubr.msk.bf16.mxu1 %vm594_vm0, %v593_v0  ;;  %v416_v4 = vld [vmem:[#allocation11] sm:$0xff]   ;;  %v417_v5 = vld [vmem:[#allocation11 + $0x8] sm:$0xff]   ;;  %189 = vst.msk [vmem:[#allocation3] sm:$0xff] %vm188_vm2, %v595_v33  ;;  %190 = vst.msk [vmem:[#allocation3 + $0x8] sm:$0xff] %vm188_vm2, %v595_v33  ;;  %v273_v35 = vand.u32 127, %v272_v34  ;;  %v596_v46 = vmov 0  }
  0x5f   :  { %379 = vmatpush3.bf16.msra.mxu0 %v413_v1  ;;  %387 = vmatpush3.bf16.msra.mxu1 %v416_v4  ;;  %v359_v36 = vld [vmem:[#allocation13] ss:$0 sm:$0xff]  ;;  %191 = vst.msk [vmem:[#allocation4] sm:$0xff] %vm188_vm2, %v596_v46  ;;  %192 = vst.msk [vmem:[#allocation4 + $0x8] sm:$0xff] %vm188_vm2, %v596_v46  ;;  %s597_s4 = smov [#allocation14]  }
  0x60   :  { %380 = vmatprep.subr.bf16.mxu0 %v593_v0  ;;  %388 = vmatprep.subr.bf16.mxu1 %v593_v0  ;;  %vm277_vm3 = vcmp.lt.s32.totalorder %v273_v35, 64  ;;  %v286_v48 = vcvt.s32.f32 %v273_v35  ;;  %s324_s24 = sshll.u32 %s597_s4, 4  ;;  %s325_s24 = int_to_ptr.vmem [resolvable:$true] %s324_s24 }
  0x61   :  { %s532_s12 = scalar_lea.vmem %s325_s24, 128  ;;  %p537_p13 = scmp.lt.s32.totalorder %s325_s24, %s325_s24 }
  0x62   :  { %p533_p12 = scmp.ne.s32.totalorder %s325_s24, %s532_s12  ;;  %p538_p0 = scmp.lt.s32.totalorder %s532_s12, %s532_s12 }
  0x63   :  { %381 = vmatpush3.bf16.msra.mxu0 %v414_v2  ;;  %389 = vmatpush3.bf16.msra.mxu1 %v417_v5 }
  0x64   :  { %p539_p1 = por %p538_p0, %p537_p13 }
  0x65   :  { %v295_v47 = vld [vmem:[#allocation3] sm:$0xff]  ;;  %v296_v52 = vld [vmem:[#allocation3 + $0x8] sm:$0xff] }
  0x66   :  { %383 = vmatmul.mubr.msk.bf16.vlgmr.msra.gmra.mrb[0].mxu0 %vm123_vm1, %v415_v3  ;;  %p540_p2 = pnand %p539_p1, %p533_p12 }
 0x139   :  { %v161_v7 = vpop.f32.mrb[0].mxu0 }
 0x13a   :  { %v162_v8 = vadd.f32 %v354_v6, %v161_v7  ;;  %v384_v9 = vpop.f32.mrb[1].mxu0 }
 0x13b   :  { %v164_v10 = vpop.f32.mrb[2].mxu0 }
 0x13c   :  { %v168_v11 = vmul.f32 %v162_v8, %v162_v8  ;;  %v165_v12 = vadd.f32 %v354_v6, %v164_v10  ;;  %v385_v13 = vpop.f32.mrb[3].mxu0 }
 0x13e   :  { %v170_v14 = vmul.f32 %v168_v11, %v162_v8  ;;  %v169_v15 = vmul.f32 %v165_v12, %v165_v12 }
 0x140   :  { %v172_v16 = vmul.f32 0.044715, %v170_v14  ;;  %v171_v17 = vmul.f32 %v169_v15, %v165_v12 }
 0x142   :  { %v174_v18 = vadd.f32 %v172_v16, %v162_v8  ;;  %v173_v19 = vmul.f32 0.044715, %v171_v17 }
 0x144   :  { %v176_v20 = vmul.f32 0.7978846, %v174_v18  ;;  %v175_v21 = vadd.f32 %v173_v19, %v165_v12 }
 0x146   :  { %418 = vtanh.f32 %v176_v20  ;;  %v177_v22 = vmul.f32 0.7978846, %v175_v21 }
 0x148   :  { %420 = vtanh.f32 %v177_v22 }
 0x150   :  { %v419_v23 = vpop.eup %418 }
 0x151   :  { %v180_v24 = vadd.f32 1.0, %v419_v23 }
 0x152   :  { %v421_v25 = vpop.eup %420 }
 0x153   :  { %v182_v26 = vmul.f32 0.5, %v180_v24  ;;  %v181_v27 = vadd.f32 1.0, %v421_v25 }
 0x155   :  { %v183_v28 = vmul.f32 0.5, %v181_v27  ;;  %v184_v29 = vmul.f32 %v182_v26, %v162_v8 }
 0x157   :  { %v185_v30 = vmul.f32 %v183_v28, %v165_v12 }
 0x159   :  { %v186_v31 = vpack.c.bf16 %v185_v30, %v184_v29 }
 0x15b   :  { %187 = vst.msk [vmem:[#allocation2] sm:$0xff] %vm123_vm1, %v186_v31 }
 0x162   :  { %v193_v32 = vld [vmem:[#allocation2] sm:$0xff] }
 0x163   :  { %391 = vmatmul.mubr.msk.bf16.vlgmr.msra.gmra.mrb[0].mxu1 %vm123_vm1, %v193_v32 }
 0x236   :  { %v255_v37 = vpop.f32.mrb[0].mxu1 }
 0x237   :  { %v256_v38 = vadd.f32 %v359_v36, %v255_v37  ;;  %v392_v39 = vpop.f32.mrb[1].mxu1 }
 0x238   :  { %v258_v40 = vpop.f32.mrb[2].mxu1 }
 0x239   :  { %v259_v41 = vadd.f32 %v359_v36, %v258_v40  ;;  %v393_v42 = vpop.f32.mrb[3].mxu1  ;;  %v278_v43 = vsel %vm277_vm3, %v256_v38, -inf }
 0x23a   :  { %280 = vmax.xlane.f32.xlu0 %v278_v43 }
 0x23b   :  { %v370_v44 = vpack.c.bf16 %v259_v41, %v256_v38  ;;  %v279_v45 = vsel %vm277_vm3, %v259_v41, -inf }
 0x23d   :  { %371 = vst [vmem:[#allocation14] sm:$0xff] %v370_v44  }
 0x23e   :  { %282 = vmax.xlane.f32.xlu0 %v279_v45 }
 0x2c7   :  { %v281_v49 = vpop.xlane.xlu0 %280 }
 0x2c8   :  { %vm297_vm4 = vcmp.gt.f32.partialorder %v281_v49, %v295_v47  ;;  %v308_v50 = vmax.f32 %v281_v49, %v295_v47  ;;  %vm284_vm5 = vcmp.eq.f32.partialorder %v278_v43, %v281_v49 }
 0x2c9   :  { %v287_v51 = vsel %vm284_vm5, %v286_v48, 1e+30 }
 0x2ca   :  { %310 = vst.msk [vmem:[#allocation3] sm:$0xff] %vm188_vm2, %v308_v50  ;;  %289 = vmin.xlane.f32.xlu1 %v287_v51 }
 0x2cb   :  { %v283_v53 = vpop.xlane.xlu0 %282 }
 0x2cc   :  { %vm298_vm6 = vcmp.gt.f32.partialorder %v283_v53, %v296_v52  ;;  %v309_v54 = vmax.f32 %v283_v53, %v296_v52  ;;  %vm285_vm7 = vcmp.eq.f32.partialorder %v279_v45, %v283_v53 }
 0x2cd   :  { %v288_v55 = vsel %vm285_vm7, %v286_v48, 1e+30 }
 0x2ce   :  { %311 = vst.msk [vmem:[#allocation3 + $0x8] sm:$0xff] %vm188_vm2, %v309_v54  ;;  %291 = vmin.xlane.f32.xlu1 %v288_v55 }
 0x2cf   :  { %543 = shalt.err (!%p540_p2)
}
 0x2d0   :  { %s544_s15 = scalar_lea.hbm %s759_s5, 128 }
 0x2d1   :  { %p545_p3 = scmp.ne.s32.totalorder %s759_s5, %s544_s15  ;;  %p548_p4 = scmp.lt.u32.totalorder %s544_s15, %s759_s5 }
 0x2d3   :  { %p550_p5 = pnand %p548_p4, %p545_p3 }
 0x2d5   :  { %553 = shalt.err (!%p550_p5)
}
 0x2d6   :  { %330 = dma.vmem_to_hbm [thread:$0]  %s325_s24, 128, %s759_s5, [#allocation7], %s588_s9, %s588_s9, %s589_s10   ;;  %v299_v58 = vld [vmem:[#allocation4] sm:$0xff]  ;;  %v300_v63 = vld [vmem:[#allocation4 + $0x8] sm:$0xff] }
 0x2d7   :  { %s598_s0 = smov [#allocation15]  }
 0x2d8   :  { %s336_s21 = sshll.u32 %s598_s0, 4  ;;  %s337_s21 = int_to_ptr.vmem [resolvable:$true] %s336_s21 }
 0x2d9   :  { %s554_s5 = scalar_lea.vmem %s337_s21, 256  ;;  %p559_p7 = scmp.lt.s32.totalorder %s337_s21, %s337_s21 }
 0x2da   :  { %p555_p6 = scmp.ne.s32.totalorder %s337_s21, %s554_s5  ;;  %p560_p8 = scmp.lt.s32.totalorder %s554_s5, %s554_s5 }
 0x2dc   :  { %p561_p9 = por %p560_p8, %p559_p7 }
 0x2de   :  { %p562_p10 = pnand %p561_p9, %p555_p6 }
 0x357   :  { %v290_v56 = vpop.xlane.xlu1 %289 }
 0x358   :  { %v394_v57 = vtrunc.f32 %v290_v56 }
 0x35a   :  { %v395_v59 = vcvt.f32.s32 %v394_v57 }
 0x35b   :  { %v292_v60 = vpop.xlane.xlu1 %291 }
 0x35c   :  { %v301_v61 = vsel %vm297_vm4, %v395_v59, %v299_v58  ;;  %v396_v62 = vtrunc.f32 %v292_v60 }
 0x35d   :  { %304 = vst.msk [vmem:[#allocation4] sm:$0xff] %vm188_vm2, %v301_v61 }
 0x35e   :  { %v397_v0 = vcvt.f32.s32 %v396_v62 }
 0x360   :  { %v302_v1 = vsel %vm298_vm6, %v397_v0, %v300_v63 }
 0x361   :  { %305 = vst.msk [vmem:[#allocation4 + $0x8] sm:$0xff] %vm188_vm2, %v302_v1 }
 0x364   :  { %v315_v2 = vld [vmem:[#allocation4] sm:$0xff] }
 0x365   :  { %317 = vst.msk [vmem:[#allocation15] sm:$0xff] %vm188_vm2, %v315_v2 }
 0x368   :  { %v316_v3 = vld [vmem:[#allocation4 + $0x8] sm:$0xff] }
 0x369   :  { %318 = vst.msk [vmem:[#allocation15 + $0x8] sm:$0xff] %vm188_vm2, %v316_v3 }
 0x36a   :  { %565 = shalt.err (!%p562_p10)
}
 0x36b   :  { %s566_s22 = scalar_lea.hbm %s760_s6, 256 }
 0x36c   :  { %p567_p11 = scmp.ne.s32.totalorder %s760_s6, %s566_s22  ;;  %p570_p12 = scmp.lt.u32.totalorder %s566_s22, %s760_s6 }
 0x36e   :  { %p572_p13 = pnand %p570_p12, %p567_p11 }
 0x370   :  { %575 = shalt.err (!%p572_p13)
}
 0x371   :  { %s599_s29 = smov 128   ;;  %s600_s30 = smov 8  }
 0x372   :  { %342 = dma.vmem_to_hbm [thread:$0]  %s337_s21, 256, %s760_s6, [#allocation16], %s599_s29, %s599_s29, %s600_s30  }
 0x373   :  { %582 = dma.done.wait [#allocation7], 128  }
 0x374   :  { %583 = vsyncadd [#allocation7], 4294967168 }
 0x375   :  { %584 = dma.done.wait [#allocation16], 256  }
 0x376   :  { %585 = vsyncadd [#allocation16], 4294967040 }
 0x377   :  { %349 = vsyncpa [#allocation6], 1 }
 0x378   :  { %350 = vsyncpa [#allocation9], 1 }
 0x379   :  { %351 = vsyncpa [#allocation12], 1 }
 0x37a   :  { %352 = vsyncpa [#allocation7], 1 }
 0x37b   :  { %353 = vsyncpa [#allocation16], 1 }

</bundles_post_ra>
